<compile_context>
chip_gen: v6e
topology: v6e:2x2x1
jax: 0.10.0
libtpu: 0.0.40
codegen_flags: <defaults>
</compile_context>

<pallas_src>
import jax
import jax.numpy as jnp
from jax.experimental import pallas as pl
from jax.experimental.pallas import tpu as pltpu


def _self_output_kernel(x_ref, w_ref, b_ref, o_ref):
    """One row-tile of y = x @ W + b (dropout is identity in eval mode)."""
    acc = jnp.dot(x_ref[...], w_ref[...], preferred_element_type=jnp.float32)
    acc = acc + b_ref[...]          # f32 bias add, broadcast over rows
    # TODO(synk): nn.Dropout(p=0.1) is identity in eval mode; no RNG mask applied.
    o_ref[...] = acc.astype(o_ref.dtype)


def vit_self_output_pallas(hidden_states, input_tensor, weight, bias,
                           *, tile_m=256, matmul_dtype=jnp.bfloat16):
    """ViTSelfOutput.forward as a Pallas kernel.

    hidden_states: (B, S, D) activations.
    input_tensor:  accepted to mirror the torch signature but UNUSED — the
                   reference module performs no residual add.
    weight:        (D_in, D_out) — pre-transposed so y = x @ W + b
                   (torch stores Linear weight as (out, in)).
    bias:          (D_out,)
    """
    del input_tensor  # faithful to the reference forward (dense output only)

    B, S, D_in = hidden_states.shape
    D_out = weight.shape[1]
    out_dtype = hidden_states.dtype

    M = B * S
    tm = min(tile_m, M)
    grid_m = pl.cdiv(M, tm)
    M_pad = grid_m * tm

    x2d = hidden_states.reshape(M, D_in)
    if M_pad != M:                              # pad rows so blocks tile exactly
        x2d = jnp.pad(x2d, ((0, M_pad - M), (0, 0)))

    x_mm = x2d.astype(matmul_dtype)
    w_mm = weight.astype(matmul_dtype)
    b_f32 = bias.astype(jnp.float32).reshape(1, D_out)

    itemsize = jnp.dtype(matmul_dtype).itemsize
    out_itemsize = jnp.dtype(out_dtype).itemsize
    flops = 2 * M_pad * D_in * D_out
    bytes_accessed = (M_pad * D_in * itemsize + D_in * D_out * itemsize
                      + D_out * 4 + M_pad * D_out * out_itemsize)

    # Double-buffered x/out tiles + weight/bias buffers, with generous headroom.
    vmem_needed = (2 * tm * D_in * itemsize + 2 * D_in * D_out * itemsize
                   + 2 * 8 * D_out * 4 + 2 * tm * D_out * out_itemsize)
    vmem_limit = int(min(128 * 1024 * 1024, max(2 * vmem_needed, 16 * 1024 * 1024)))

    out2d = pl.pallas_call(
        _self_output_kernel,
        out_shape=jax.ShapeDtypeStruct((M_pad, D_out), out_dtype),
        grid=(grid_m,),
        in_specs=[
            pl.BlockSpec((tm, D_in), lambda i: (i, 0)),      # row tile of x
            pl.BlockSpec((D_in, D_out), lambda i: (0, 0)),   # resident weight
            pl.BlockSpec((1, D_out), lambda i: (0, 0)),      # resident bias
        ],
        out_specs=pl.BlockSpec((tm, D_out), lambda i: (i, 0)),
        compiler_params=pltpu.CompilerParams(
            dimension_semantics=("parallel",),
            vmem_limit_bytes=vmem_limit,
        ),
        cost_estimate=pl.CostEstimate(
            flops=flops, transcendentals=0, bytes_accessed=int(bytes_accessed)),
    )(x_mm, w_mm, b_f32)

    if M_pad != M:
        out2d = out2d[:M]
    return out2d.reshape(B, S, D_out)


def vit_self_output_ref(hidden_states, input_tensor, weight, bias):
    """Pure-JAX reference mirroring the PyTorch forward (eval mode)."""
    del input_tensor
    return hidden_states @ weight + bias


if __name__ == "__main__":
    B, S, D = 2, 8, 32
    key = jax.random.PRNGKey(0)
    k1, k2, k3, k4 = jax.random.split(key, 4)

    hidden_states = jax.random.normal(k1, (B, S, D), jnp.float32)
    input_tensor = jax.random.normal(k2, (B, S, D), jnp.float32)  # ignored by forward
    # weight stored as (in, out) == torch Linear weight (out, in) transposed
    weight = jax.random.normal(k3, (D, D), jnp.float32) * 0.02
    bias = jax.random.normal(k4, (D,), jnp.float32) * 0.01

    ref = vit_self_output_ref(hidden_states, input_tensor, weight, bias)

    # Fast path: bf16 MXU matmul with f32 accumulation.
    out_bf16 = vit_self_output_pallas(hidden_states, input_tensor, weight, bias,
                                      matmul_dtype=jnp.bfloat16)
    out_bf16 = jax.block_until_ready(out_bf16)
    assert out_bf16.shape == (B, S, D)
    assert jnp.allclose(out_bf16, ref, rtol=3e-2, atol=3e-2), "bf16 kernel mismatch"

    # Full-precision path for a tight numerical check against the reference.
    out_f32 = vit_self_output_pallas(hidden_states, input_tensor, weight, bias,
                                     matmul_dtype=jnp.float32)
    out_f32 = jax.block_until_ready(out_f32)
    assert jnp.allclose(out_f32, ref, rtol=1e-4, atol=1e-4), "f32 kernel mismatch"

    print("KERNEL_OK")
</pallas_src>

<mosaic_0001>
module attributes {stable_mosaic.version = 11 : i64} {
  func.func @_self_output_kernel(%arg0: i32, %arg1: memref<16x32xbf16, #tpu.memory_space<vmem>>, %arg2: memref<32x32xbf16, #tpu.memory_space<vmem>>, %arg3: memref<1x32xf32, #tpu.memory_space<vmem>>, %arg4: memref<16x32xf32, #tpu.memory_space<vmem>>) attributes {dimension_semantics = [#tpu.dimension_semantics<parallel>], iteration_bounds = array<i64: 1>, scalar_prefetch = 0 : i64, scratch_operands = 0 : i64, tpu.core_type = #tpu.core_type<tc>, window_params = [{transform_indices = @transform_0, window_bounds = array<i64: 16, 32>}, {pipeline_mode = #tpu.pipeline_mode<synchronous>, transform_indices = @transform_1, window_bounds = array<i64: 32, 32>}, {pipeline_mode = #tpu.pipeline_mode<synchronous>, transform_indices = @transform_2, window_bounds = array<i64: 1, 32>}, {transform_indices = @transform_3, window_bounds = array<i64: 16, 32>}]} {
    %c0 = arith.constant 0 : index
    %c0_0 = arith.constant 0 : index
    %0 = vector.load %arg1[%c0, %c0_0] : memref<16x32xbf16, #tpu.memory_space<vmem>>, vector<16x32xbf16>
    %c0_1 = arith.constant 0 : index
    %c0_2 = arith.constant 0 : index
    %1 = vector.load %arg2[%c0_1, %c0_2] : memref<32x32xbf16, #tpu.memory_space<vmem>>, vector<32x32xbf16>
    %cst = arith.constant dense<0.000000e+00> : vector<16x32xf32>
    %2 = tpu.matmul %0, %1, %cst {dimension_numbers = #tpu.dot_dimension_numbers<[1], [0], [0], [1], [0, 0, 1, 1], [], []>} : vector<16x32xbf16>, vector<32x32xbf16>, vector<16x32xf32> -> vector<16x32xf32>
    %c0_3 = arith.constant 0 : index
    %c0_4 = arith.constant 0 : index
    %3 = vector.load %arg3[%c0_3, %c0_4] : memref<1x32xf32, #tpu.memory_space<vmem>>, vector<1x32xf32>
    %4 = vector.broadcast %3 : vector<1x32xf32> to vector<16x32xf32>
    %5 = arith.addf %2, %4 : vector<16x32xf32>
    %c0_5 = arith.constant 0 : index
    %c0_6 = arith.constant 0 : index
    %6 = vector.load %arg4[%c0_5, %c0_6] : memref<16x32xf32, #tpu.memory_space<vmem>>, vector<16x32xf32>
    tpu.vector_store %arg4[%c0_5, %c0_6], %5 {strides = array<i32>} : memref<16x32xf32, #tpu.memory_space<vmem>>, vector<16x32xf32>,
    return
  }
  func.func @transform_0(%arg0: i32) -> (i32, i32) {
    %c0_i32 = arith.constant 0 : i32
    %c0_i32_0 = arith.constant 0 : i32
    return %arg0, %c0_i32 : i32, i32
  }
  func.func @transform_1(%arg0: i32) -> (i32, i32) {
    %c0_i32 = arith.constant 0 : i32
    %c0_i32_0 = arith.constant 0 : i32
    %c0_i32_1 = arith.constant 0 : i32
    return %c0_i32, %c0_i32_0 : i32, i32
  }
  func.func @transform_2(%arg0: i32) -> (i32, i32) {
    %c0_i32 = arith.constant 0 : i32
    %c0_i32_0 = arith.constant 0 : i32
    %c0_i32_1 = arith.constant 0 : i32
    return %c0_i32, %c0_i32_0 : i32, i32
  }
  func.func @transform_3(%arg0: i32) -> (i32, i32) {
    %c0_i32 = arith.constant 0 : i32
    %c0_i32_0 = arith.constant 0 : i32
    return %arg0, %c0_i32 : i32, i32
  }
}

</mosaic_0001>

<bundles_post_ra>
// kernel: tpu_custom_call.1
= control target key start
LH: loop header
LB: loop body
LE: loop exit
PB: predicated region body
PF: predicated region fallthrough
CT: control target
= control target key end

     0   :  { %8 = vsyncpa [#allocation3], 0  ;;  %s274_s0 = inlined_call_operand.hbm [shape: bf16[16,32], index: 0, kind: input, shape index: {}]   ;;  %s275_s1 = inlined_call_operand.hbm [shape: bf16[32,32], index: 1, kind: input, shape index: {}]   ;;  %s276_s2 = inlined_call_operand.vmem [shape: f32[1,32], index: 2, kind: input, shape index: {}]   ;;  %s277_s3 = inlined_call_operand.hbm [shape: f32[16,32], index: 3, kind: output, shape index: {}]  }
   0x1   :  { %9 = vsyncpa [#allocation6], 0 }
   0x2   :  { %10 = vsyncpa [#allocation4], 0  ;;  %s233_s12 = smov [#allocation2]  }
   0x3   :  { %s16_s13 = sshll.u32 %s233_s12, 4  ;;  %s17_s13 = int_to_ptr.vmem [resolvable:$true] %s16_s13 }
   0x4   :  { %s175_s14 = scalar_lea.vmem %s17_s13, 128  ;;  %p180_p1 = scmp.lt.s32.totalorder %s17_s13, %s17_s13 }
   0x5   :  { %p176_p0 = scmp.ne.s32.totalorder %s17_s13, %s175_s14  ;;  %p181_p2 = scmp.lt.s32.totalorder %s175_s14, %s175_s14 }
   0x7   :  { %p182_p3 = por %p181_p2, %p180_p1 }
   0x9   :  { %p183_p4 = pnand %p182_p3, %p176_p0 }
   0xb   :  { %186 = shalt.err (!%p183_p4)
}
   0xc   :  { %s234_s15 = smov 64   ;;  %s235_s16 = smov 4  }
   0xd   :  { %22 = dma.hbm_to_vmem [thread:$0]  %s274_s0, 128, %s17_s13, [#allocation3], %s234_s15, %s234_s15, %s235_s16  }
   0xe   :  { %s236_s19 = smov [#allocation5]  }
   0xf   :  { %s28_s20 = sshll.u32 %s236_s19, 4  ;;  %s29_s20 = int_to_ptr.vmem [resolvable:$true] %s28_s20 }
  0x10   :  { %s195_s21 = scalar_lea.vmem %s29_s20, 256  ;;  %p200_p6 = scmp.lt.s32.totalorder %s29_s20, %s29_s20 }
  0x11   :  { %p196_p5 = scmp.ne.s32.totalorder %s29_s20, %s195_s21  ;;  %p201_p7 = scmp.lt.s32.totalorder %s195_s21, %s195_s21 }
  0x13   :  { %p202_p8 = por %p201_p7, %p200_p6 }
  0x15   :  { %p203_p9 = pnand %p202_p8, %p196_p5 }
  0x17   :  { %206 = shalt.err (!%p203_p9)
}
  0x18   :  { %34 = dma.hbm_to_vmem [thread:$0]  %s275_s1, 256, %s29_s20, [#allocation6], %s234_s15, %s234_s15, %s235_s16  }
  0x19   :  { %227 = dma.done.wait [#allocation3], 128  }
  0x1a   :  { %228 = vsyncadd [#allocation3], 4294967168 }
  0x1b   :  { %229 = dma.done.wait [#allocation6], 256  }
  0x1c   :  { %230 = vsyncadd [#allocation6], 4294967040  ;;  %v237_v0 = vmov 0.0   ;;  %vm238_vm0 = vmmov 0   ;;  %v164_v1 = vld [vmem:[#allocation5 + $0x8] sm:$0xff]   ;;  %v165_v2 = vld [vmem:[#allocation5] sm:$0xff]  }
  0x1d   :  { %147 = vmatprep.subr.bf16.mxu0 %v237_v0  ;;  %151 = vmatprep.mubr.msk.bf16.mxu0 %vm238_vm0, %v237_v0  ;;  %v166_v3 = vld [vmem:[#allocation2] sm:$0xff]   ;;  %vm74_vm1 = vcmask 261120   ;;  %s239_s1 = smov [#allocation7]  }
  0x1e   :  { %148 = vmatpush3.bf16.msra.mxu0 %v164_v1  ;;  %v139_v4 = vld [vmem:[%s276_s2] ss:$0 sm:$0xff]  ;;  %s126_s25 = sshll.u32 %s239_s1, 4  ;;  %s127_s25 = int_to_ptr.vmem [resolvable:$true] %s126_s25 }
  0x1f   :  { %149 = vmatprep.subr.bf16.mxu0 %v237_v0  ;;  %s207_s26 = scalar_lea.vmem %s127_s25, 256  ;;  %p212_p11 = scmp.lt.s32.totalorder %s127_s25, %s127_s25 }
  0x20   :  { %p208_p10 = scmp.ne.s32.totalorder %s127_s25, %s207_s26  ;;  %p213_p12 = scmp.lt.s32.totalorder %s207_s26, %s207_s26 }
  0x22   :  { %150 = vmatpush3.bf16.msra.mxu0 %v165_v2  ;;  %p214_p13 = por %p213_p12, %p212_p11 }
  0x24   :  { %p215_p0 = pnand %p214_p13, %p208_p10 }
  0x25   :  { %152 = vmatmul.mubr.msk.bf16.vlgmr.msra.gmra.mxu0 %vm74_vm1, %v166_v3 }
  0xe5   :  { %v112_v5 = vpop.f32.mrf.mxu0 }
  0xe6   :  { %v113_v6 = vadd.f32 %v139_v4, %v112_v5 }
  0xe7   :  { %v153_v7 = vpop.f32.mrf.mxu0 }
  0xe8   :  { %119 = vst.msk [vmem:[#allocation7] sm:$0xff] %vm74_vm1, %v113_v6 }
  0xe9   :  { %v115_v8 = vpop.f32.mrf.mxu0 }
  0xea   :  { %v116_v9 = vadd.f32 %v139_v4, %v115_v8 }
  0xeb   :  { %v154_v10 = vpop.f32.mrf.mxu0 }
  0xec   :  { %120 = vst.msk [vmem:[#allocation7 + $0x8] sm:$0xff] %vm74_vm1, %v116_v9 }
  0xed   :  { %218 = shalt.err (!%p215_p0)
}
  0xee   :  { %s240_s27 = smov 128   ;;  %s241_s2 = smov 8  }
  0xef   :  { %132 = dma.vmem_to_hbm [thread:$0]  %s127_s25, 256, %s277_s3, [#allocation4], %s240_s27, %s240_s27, %s241_s2  }
  0xf0   :  { %231 = dma.done.wait [#allocation4], 256  }
  0xf1   :  { %232 = vsyncadd [#allocation4], 4294967040 }
  0xf2   :  { %136 = vsyncpa [#allocation3], 1 }
  0xf3   :  { %137 = vsyncpa [#allocation6], 1 }
  0xf4   :  { %138 = vsyncpa [#allocation4], 1 }

</bundles_post_ra>
